<compile_context>
chip_gen: v5e
topology: v5e:2x2
jax: 0.10.0
libtpu: 0.0.40
codegen_flags: <defaults>
</compile_context>

<pallas_src>
import functools

import jax
import jax.numpy as jnp
from jax import lax
from jax.experimental import pallas as pl
from jax.experimental.pallas import tpu as pltpu


# ----------------------------- Pallas kernel ------------------------------
def _conv_relu_kernel(p_ref, w_ref, b_ref, o_ref):
    """One fused MXU dot + bias + ReLU for one image.

    p_ref : (1, KKC, HW)  bf16  im2col patches, rows = (tap, cin), cols = H*W
    w_ref : (Cout, KKC)   bf16  tap-major flattened conv weights
    b_ref : (Cout, 1)     f32   bias column (broadcast over the HW lanes)
    o_ref : (1, Cout, HW) f32   lane-dense output tile (NCHW-flat)
    """
    acc = jnp.dot(w_ref[...], p_ref[0],
                  preferred_element_type=jnp.float32)        # (Cout, HW) f32
    o_ref[0] = jnp.maximum(acc + b_ref[...], 0.0).astype(o_ref.dtype)


# ------------------------------ wrapper call -------------------------------
def conv2d_relu_pallas(x_nchw, weight, bias, *, k=3):
    """x_nchw: [N, Cin, H, W] f32; weight: [Cout, Cin, k, k] f32; bias: [Cout] f32."""
    N, C, H, W = x_nchw.shape
    Cout = weight.shape[0]
    pad = k // 2
    HW = H * W
    KKC = k * k * C

    # --- XLA-side prep: im2col patch matrix (N, k*k*C, H*W), bf16 ---------
    xp = jnp.pad(x_nchw, ((0, 0), (0, 0), (pad, pad), (pad, pad)))
    taps = [xp[:, :, dy:dy + H, dx:dx + W]                   # 9 x (N, C, H, W)
            for dy in range(k) for dx in range(k)]
    patches = (jnp.stack(taps, axis=1)                        # (N, k*k, C, H, W)
               .reshape(N, KKC, HW)
               .astype(jnp.bfloat16))

    # (Cout, Cin, kh, kw) -> (Cout, kh*kw*Cin): row order matches patches rows.
    w_km = weight.transpose(0, 2, 3, 1).reshape(Cout, KKC).astype(jnp.bfloat16)
    b_col = bias.reshape(Cout, 1).astype(jnp.float32)

    # Honest cost estimate (no padding inflation).
    flops = 2 * N * HW * KKC * Cout
    bytes_accessed = (patches.size * 2 + w_km.size * 2 + b_col.size * 4
                      + N * Cout * HW * 4)

    out = pl.pallas_call(
        _conv_relu_kernel,
        out_shape=jax.ShapeDtypeStruct((N, Cout, HW), jnp.float32),
        grid_spec=pltpu.PrefetchScalarGridSpec(
            num_scalar_prefetch=0,
            grid=(N,),  # one image per step; "parallel" feeds both v7x TCs
            in_specs=[
                pl.BlockSpec((1, KKC, HW), lambda n: (n, 0, 0)),
                pl.BlockSpec((Cout, KKC), lambda n: (0, 0)),
                pl.BlockSpec((Cout, 1), lambda n: (0, 0)),
            ],
            out_specs=pl.BlockSpec((1, Cout, HW), lambda n: (n, 0, 0)),
        ),
        compiler_params=pltpu.CompilerParams(
            dimension_semantics=("parallel",)),
        cost_estimate=pl.CostEstimate(
            flops=flops, transcendentals=0, bytes_accessed=bytes_accessed),
    )(patches, w_km, b_col)

    # Already NCHW-flat: only a free reshape remains.
    return out.reshape(N, Cout, H, W)


# ------------------------------ DistModule ---------------------------------
class DistModuleJAX:
    """Pallas analogue of DistModule wrapping Conv2d(4, 8, 3, pad=1) + ReLU."""

    def __init__(self, cin=4, cout=8, k=3, sync=False):
        self.sync = sync
        self.cin, self.cout, self.k = cin, cout, k
        # Deterministic param init == broadcast of rank-0 params (single device).
        kw0, kb = jax.random.split(jax.random.PRNGKey(42))
        fan_in = cin * k * k
        self.weight = (jax.random.normal(kw0, (cout, cin, k, k), jnp.float32)
                       / jnp.sqrt(fan_in))
        self.bias = jax.random.normal(kb, (cout,), jnp.float32) * 0.1
        self._fwd = jax.jit(functools.partial(conv2d_relu_pallas, k=k))

    def __call__(self, x):
        # x: [N, C, H, W] (NCHW, matching the wrapped PyTorch module)
        return self._fwd(x, self.weight, self.bias)


# -------------------------------- main --------------------------------------
if __name__ == "__main__":
    key = jax.random.PRNGKey(0)
    x = jax.random.normal(key, (2, 4, 16, 16), jnp.float32)   # NCHW

    model = DistModuleJAX(cin=4, cout=8, k=3, sync=False)
    y = jax.block_until_ready(model(x))

    # Reference: f32 conv of the same bf16-rounded inputs (the kernel multiplies
    # in bf16 with exact products + f32 accumulation), bias + ReLU.
    xb = x.astype(jnp.bfloat16).astype(jnp.float32)
    wb = model.weight.astype(jnp.bfloat16).astype(jnp.float32)
    ref = lax.conv_general_dilated(
        xb, wb, window_strides=(1, 1), padding="SAME",
        dimension_numbers=("NCHW", "OIHW", "NCHW"))
    ref = jnp.maximum(ref + model.bias.reshape(1, -1, 1, 1), 0.0)

    assert y.shape == (2, 8, 16, 16)
    err = float(jnp.max(jnp.abs(y - ref)))
    assert jnp.allclose(y, ref, atol=1e-3, rtol=1e-3), f"max abs err {err}"

    print("KERNEL_OK")
</pallas_src>

<mosaic_0001>
module attributes {stable_mosaic.version = 11 : i64} {
  func.func @_conv_relu_kernel(%arg0: i32, %arg1: memref<1x36x256xbf16, #tpu.memory_space<vmem>>, %arg2: memref<8x36xbf16, #tpu.memory_space<vmem>>, %arg3: memref<8x1xf32, #tpu.memory_space<vmem>>, %arg4: memref<1x8x256xf32, #tpu.memory_space<vmem>>) attributes {dimension_semantics = [#tpu.dimension_semantics<parallel>], iteration_bounds = array<i64: 2>, scalar_prefetch = 0 : i64, scratch_operands = 0 : i64, tpu.core_type = #tpu.core_type<tc>, window_params = [{transform_indices = @transform_0, window_bounds = array<i64: 1, 36, 256>}, {pipeline_mode = #tpu.pipeline_mode<synchronous>, transform_indices = @transform_1, window_bounds = array<i64: 8, 36>}, {pipeline_mode = #tpu.pipeline_mode<synchronous>, transform_indices = @transform_2, window_bounds = array<i64: 8, 1>}, {transform_indices = @transform_3, window_bounds = array<i64: 1, 8, 256>}]} {
    %c0 = arith.constant 0 : index
    %c0_0 = arith.constant 0 : index
    %0 = vector.load %arg2[%c0, %c0_0] : memref<8x36xbf16, #tpu.memory_space<vmem>>, vector<8x36xbf16>
    %c0_1 = arith.constant 0 : index
    %c0_2 = arith.constant 0 : index
    %c0_3 = arith.constant 0 : index
    %1 = vector.load %arg1[%c0_1, %c0_2, %c0_3] : memref<1x36x256xbf16, #tpu.memory_space<vmem>>, vector<1x36x256xbf16>
    %2 = vector.shape_cast %1 : vector<1x36x256xbf16> to vector<36x256xbf16>
    %cst = arith.constant dense<0.000000e+00> : vector<8x256xf32>
    %3 = tpu.matmul %0, %2, %cst {dimension_numbers = #tpu.dot_dimension_numbers<[1], [0], [0], [1], [0, 0, 1, 1], [], []>} : vector<8x36xbf16>, vector<36x256xbf16>, vector<8x256xf32> -> vector<8x256xf32>
    %c0_4 = arith.constant 0 : index
    %c0_5 = arith.constant 0 : index
    %4 = vector.load %arg3[%c0_4, %c0_5] : memref<8x1xf32, #tpu.memory_space<vmem>>, vector<8x1xf32>
    %5 = vector.broadcast %4 : vector<8x1xf32> to vector<8x256xf32>
    %6 = arith.addf %3, %5 : vector<8x256xf32>
    %cst_6 = arith.constant 0.000000e+00 : f32
    %7 = vector.broadcast %cst_6 : f32 to vector<8x256xf32>
    %8 = arith.maximumf %6, %7 : vector<8x256xf32>
    %c0_7 = arith.constant 0 : index
    %c0_8 = arith.constant 0 : index
    %c0_9 = arith.constant 0 : index
    %9 = vector.load %arg4[%c0_7, %c0_8, %c0_9] : memref<1x8x256xf32, #tpu.memory_space<vmem>>, vector<1x8x256xf32>
    %10 = vector.shape_cast %9 : vector<1x8x256xf32> to vector<8x256xf32>
    %11 = vector.shape_cast %8 : vector<8x256xf32> to vector<1x8x256xf32>
    tpu.vector_store %arg4[%c0_7, %c0_8, %c0_9], %11 {strides = array<i32>} : memref<1x8x256xf32, #tpu.memory_space<vmem>>, vector<1x8x256xf32>,
    return
  }
  func.func @transform_0(%arg0: i32) -> (i32, i32, i32) {
    %c0_i32 = arith.constant 0 : i32
    %c0_i32_0 = arith.constant 0 : i32
    %c0_i32_1 = arith.constant 0 : i32
    return %arg0, %c0_i32, %c0_i32_0 : i32, i32, i32
  }
  func.func @transform_1(%arg0: i32) -> (i32, i32) {
    %c0_i32 = arith.constant 0 : i32
    %c0_i32_0 = arith.constant 0 : i32
    %c0_i32_1 = arith.constant 0 : i32
    return %c0_i32, %c0_i32_0 : i32, i32
  }
  func.func @transform_2(%arg0: i32) -> (i32, i32) {
    %c0_i32 = arith.constant 0 : i32
    %c0_i32_0 = arith.constant 0 : i32
    %c0_i32_1 = arith.constant 0 : i32
    return %c0_i32, %c0_i32_0 : i32, i32
  }
  func.func @transform_3(%arg0: i32) -> (i32, i32, i32) {
    %c0_i32 = arith.constant 0 : i32
    %c0_i32_0 = arith.constant 0 : i32
    %c0_i32_1 = arith.constant 0 : i32
    return %arg0, %c0_i32, %c0_i32_0 : i32, i32, i32
  }
}

</mosaic_0001>

<bundles_post_ra>
// kernel: conv2d_relu_pallas.1
= control target key start
LH: loop header
LB: loop body
LE: loop exit
PB: predicated region body
PF: predicated region fallthrough
CT: control target
= control target key end

     0   :  { %s378_s12 = smov 0   ;;  %s405_s0 = inlined_call_operand.vmem [shape: bf16[2,36,256], index: 0, kind: input, shape index: {}]   ;;  %s406_s1 = inlined_call_operand.vmem [shape: bf16[8,36], index: 1, kind: input, shape index: {}]   ;;  %s407_s2 = inlined_call_operand.vmem [shape: f32[8,1], index: 2, kind: input, shape index: {}]   ;;  %s408_s3 = inlined_call_operand.vmem [shape: f32[2,8,256], index: 3, kind: output, shape index: {}]  }
   0x1 LB: > { %s305_s13 = sadd.s32 4294967295, %s355_s12   ;;  %p309_p0 = scmp.ge.s32.totalorder %s355_s12, 1  ;;  %s355_s12 = sphi %s378_s12, %s13_s12  }
   0x2   : > { %p137_p1 = scmp.lt.s32.totalorder %s355_s12, 3 }
   0x4   : > { %p138_p2 = pnand %p309_p0, %p137_p1 }
   0x5   : > { %p161_p3 = scmp.lt.s32.totalorder (!%p138_p2), %s305_s13, 1 }
   0x6   : > { %141 = sbr.rel (%p138_p2) target bundleno = 166 (0xa6), region = 32 }
   0xb   : > { %v357_v0 = vmov 0   ;;  %v178_v1 = vld [vmem:[%s407_s2] sm:$0xff]  ;;  %s410_s13 = smov (!%p161_p3, %s305_s13), 1  ;;  %vm213_vm0 = vcmask 1041408   ;;  %vm209_vm1 = vcmask 293888  }
   0xc   : > { %348 = vset.pattern.permute.xlu0 %v357_v0  ;;  %s338_s16 = smul.u32 40, %s410_s13  ;;  %v172_v21 = vld [vmem:[%s406_s1] sm:$0xf]  ;;  %s333_s22 = sshll.u32 %s410_s13, 4 }
   0xd   : > { %181 = vperm.xlu0 %348, %v178_v1   ;;  %s170_s25 = scalar_lea.vmem %s408_s3, %s333_s22 }
   0xe   : > { %s165_s19 = scalar_lea.vmem %s405_s0, %s338_s16 }
   0xf   : > { %v177_v2 = vld [vmem:[%s165_s19 + $0x20] sm:$0x33]  ;;  %v323_v5 = vld [vmem:[%s165_s19 + $0x10] sm:$0xf]  ;;  %v337_v8 = vld [vmem:[%s165_s19 + $0x14] sm:$0xf0] }
  0x10   : > { %v197_v3 = vunpack.c.l.b16 %v177_v2  ;;  %v198_v4 = vunpack.c.h.b16 %v177_v2  ;;  %v336_v9 = vld [vmem:[%s165_s19 + $0x14] sm:$0xf]  ;;  %v325_v10 = vld [vmem:[%s165_s19 + $0x18] sm:$0xf0]  ;;  %v324_v13 = vor.u32 %v337_v8, %v323_v5  ;;  %v315_v15 = vld [vmem:[%s165_s19] sm:$0xf] }
  0x11   : > { %v328_v14 = vor.u32 %v336_v9, %v325_v10  ;;  %v335_v16 = vld [vmem:[%s165_s19 + $0x4] sm:$0xf0]  ;;  %v334_v17 = vld [vmem:[%s165_s19 + $0x4] sm:$0xf]  ;;  %v317_v18 = vld [vmem:[%s165_s19 + $0x8] sm:$0xf0] }
  0x12   : > { %v203_v6 = vpack.c.b16 %v197_v3, %v197_v3  ;;  %v204_v7 = vpack.c.b16 %v198_v4, %v198_v4  ;;  %v316_v19 = vor.u32 %v335_v16, %v315_v15  ;;  %v320_v20 = vor.u32 %v334_v17, %v317_v18 }
  0x14   : > { %v215_v11 = vsel %vm213_vm0, %v203_v6, 0  ;;  %v218_v12 = vsel %vm213_vm0, %v204_v7, 0 }
  0x15   : > { %225 = vmatpush.bf16.msra.mxu0 %v215_v11  ;;  %238 = vmatpush.bf16.msra.mxu1 %v218_v12 }
  0x19   : > { %226 = vmatpush.bf16.msra.mxu0 %v324_v13  ;;  %239 = vmatpush.bf16.msra.mxu1 %v328_v14 }
  0x1d   : > { %227 = vmatpush.bf16.msra.mxu0 %v316_v19  ;;  %240 = vmatpush.bf16.msra.mxu1 %v320_v20 }
  0x20   : > { %329 = vmatmul.msk.bf16.vlgmr.msra.gmra.mxu0 %vm209_vm1, %v172_v21  ;;  %330 = vmatmul.msk.bf16.vlgmr.msra.gmra.mxu1 %vm209_vm1, %v172_v21 }
  0x7f   : > { %v182_v22 = vpop.permute.xlu0 %181 }
  0x9d   : > { %v229_v23 = vpop.f32.mrf.mxu0  ;;  %v242_v24 = vpop.f32.mrf.mxu1 }
  0x9e   : > { %v230_v25 = vadd.f32 %v229_v23, %v182_v22  ;;  %v243_v26 = vadd.f32 %v242_v24, %v182_v22 }
  0xa0   : > { %v246_v27 = vmax.f32 %v230_v25, 0.0  ;;  %v247_v28 = vmax.f32 %v243_v26, 0.0 }
  0xa2   : > { %248 = vst [vmem:[%s170_s25] sm:$0xff] %v246_v27 }
  0xa3   : > { %249 = vst [vmem:[%s170_s25 + $0x8] sm:$0xff] %v247_v28 }
  0xa5   : > { %v231_v29 = vpop.f32.mrf.mxu0  ;;  %v244_v30 = vpop.f32.mrf.mxu1 }
  0xa6 PF: > { %s13_s12 = sadd.s32 1, %s355_s12  }
  0xa7   : > { %p10_p4 = scmp.ge.s32.totalorder %s13_s12, 4  }
  0xa9   :  { %12 = sbr.rel (!%p10_p4) target bundleno = 1 (0x1), region = 62 }

</bundles_post_ra>
